<compile_context>
chip_gen: v6e
topology: v6e:2x2x1
jax: 0.10.0
libtpu: 0.0.40
codegen_flags: <defaults>
</compile_context>

<pallas_src>
import numpy as np
import jax
import jax.numpy as jnp
from jax.experimental import pallas as pl
from jax.experimental.pallas import tpu as pltpu

NumClass = 2


def _rup(n, m):
    return ((n + m - 1) // m) * m


def _rup8(n):
    return _rup(n, 8)


# ---------------------------------------------------------------------------
# Kernel
# ---------------------------------------------------------------------------
def _make_kernel(din, c1p, c2p, c3p, ow1, ob1, ow2, ob2, ow3, ob3):
    """All offsets/widths are static Python ints -> slices are compile-time,
    (8,128)-tile aligned (row offsets % 8 == 0, lane widths % 128 == 0)."""

    def kernel(x_ref, p_ref, out_ref):
        x = x_ref[...]                                    # (TB, din)

        # ---- stage 1: fused [fc1 | fc4.0 | experts.0], K = din = 2 --------
        # Depth-2 contraction on the VPU (broadcast multiply-adds) instead of
        # an MXU matmul: avoids a push/drain round-trip for a K=2 operand.
        h = p_ref[ob1:ob1 + 1, 0:c1p]                     # (1, c1p) bias row
        for k in range(din):                              # static, din == 2
            h = h + x[:, k:k + 1] * p_ref[ow1 + k:ow1 + k + 1, 0:c1p]
        h = jnp.maximum(h, 0.0)                           # (TB, c1p)

        # ---- stage 2: blockdiag(fc2, fc4.1, experts.1) on the MXU ----------
        w2 = p_ref[ow2:ow2 + c1p, 0:c2p]                  # aligned ref view
        b2 = p_ref[ob2:ob2 + 1, 0:c2p]
        h = jnp.maximum(
            jnp.dot(h, w2, preferred_element_type=jnp.float32) + b2, 0.0)

        # ---- stage 3: blockdiag(fc3, fc4.2, experts.2) ---------------------
        # Output is lane-dense and lane-contiguous:
        #   [y_res | weight_expert | coeff_flat | zero padding]
        w3 = p_ref[ow3:ow3 + c2p, 0:c3p]
        b3 = p_ref[ob3:ob3 + 1, 0:c3p]
        out_ref[...] = (jnp.dot(h, w3, preferred_element_type=jnp.float32)
                        + b3).astype(out_ref.dtype)

    return kernel


# ---------------------------------------------------------------------------
# Parameter packing (host / plain-XLA side, done once)
# ---------------------------------------------------------------------------
def pack_params(p, dim_in, num_basis, num_experts, dim_out):
    E, nb = num_experts, num_basis
    assert dim_in == 2, "fc4 / expert heads are Linear(2, ...) applied to x"

    c1 = 64 + 32 * (E + 1)                 # fc1 | fc4.0 | experts.0
    c2 = 32 + 16 * (E + 1)                 # fc2 | fc4.1 | experts.1
    c3 = dim_out + E + E * nb              # fc3 | fc4.2 | experts.2
    c1p, c2p, c3p = _rup(c1, 128), _rup(c2, 128), _rup(c3, 128)   # lane-dense
    pc = max(c1p, c2p, c3p)

    # stage 1: dense concat along the output-lane axis (zero-padded to c1p)
    w1f = jnp.zeros((dim_in, c1p), jnp.float32)
    b1f = jnp.zeros((1, c1p), jnp.float32)
    w1f = w1f.at[:, 0:64].set(p["w1"]).at[:, 64:96].set(p["w4a"])
    b1f = b1f.at[:, 0:64].set(p["b1"]).at[:, 64:96].set(p["b4a"])
    for i in range(E):
        w1f = w1f.at[:, 96 + 32 * i:128 + 32 * i].set(p["w5a"][i])
        b1f = b1f.at[:, 96 + 32 * i:128 + 32 * i].set(p["b5a"][i])

    # stage 2: block-diagonal (off-diagonal + padding exactly zero)
    w2f = jnp.zeros((c1p, c2p), jnp.float32)
    b2f = jnp.zeros((1, c2p), jnp.float32)
    w2f = w2f.at[0:64, 0:32].set(p["w2"]).at[64:96, 32:48].set(p["w4b"])
    b2f = b2f.at[:, 0:32].set(p["b2"]).at[:, 32:48].set(p["b4b"])
    for i in range(E):
        w2f = w2f.at[96 + 32 * i:128 + 32 * i,
                     48 + 16 * i:64 + 16 * i].set(p["w5b"][i])
        b2f = b2f.at[:, 48 + 16 * i:64 + 16 * i].set(p["b5b"][i])

    # stage 3: block-diagonal
    w3f = jnp.zeros((c2p, c3p), jnp.float32)
    b3f = jnp.zeros((1, c3p), jnp.float32)
    w3f = w3f.at[0:32, 0:dim_out].set(p["w3"])
    w3f = w3f.at[32:48, dim_out:dim_out + E].set(p["w4c"])
    b3f = b3f.at[:, 0:dim_out].set(p["b3"])
    b3f = b3f.at[:, dim_out:dim_out + E].set(p["b4c"])
    for i in range(E):
        w3f = w3f.at[48 + 16 * i:64 + 16 * i,
                     dim_out + E + nb * i:dim_out + E + nb * (i + 1)].set(p["w5c"][i])
        b3f = b3f.at[:, dim_out + E + nb * i:dim_out + E + nb * (i + 1)].set(p["b5c"][i])

    # single packed buffer; row offsets are multiples of 8, lane widths
    # multiples of 128, so every in-kernel slice is (8,128)-tile aligned.
    ow1 = 0
    ob1 = _rup8(dim_in)
    ow2 = ob1 + 8
    ob2 = ow2 + c1p
    ow3 = ob2 + 8
    ob3 = ow3 + c2p
    rows = ob3 + 8

    packed = jnp.zeros((rows, pc), jnp.float32)
    packed = packed.at[ow1:ow1 + dim_in, 0:c1p].set(w1f)
    packed = packed.at[ob1:ob1 + 1, 0:c1p].set(b1f)
    packed = packed.at[ow2:ow2 + c1p, 0:c2p].set(w2f)
    packed = packed.at[ob2:ob2 + 1, 0:c2p].set(b2f)
    packed = packed.at[ow3:ow3 + c2p, 0:c3p].set(w3f)
    packed = packed.at[ob3:ob3 + 1, 0:c3p].set(b3f)

    meta = dict(din=dim_in, c1p=c1p, c2p=c2p, c3p=c3p, c3=c3,
                ow1=ow1, ob1=ob1, ow2=ow2, ob2=ob2, ow3=ow3, ob3=ob3,
                dim_out=dim_out, E=E, nb=nb)
    return packed, meta


# ---------------------------------------------------------------------------
# Batch-tile selection
# ---------------------------------------------------------------------------
def _pick_tile_b(B, max_tile=4096):
    """Large tiles amortize the ~0.35us per-grid-step overhead; for B > 256
    keep >= 2 steps so v7x's second TensorCore gets work under
    dimension_semantics=("parallel",).  Ragged B is handled by zero-padding
    the batch up to a multiple of the tile in the wrapper."""
    if B <= 256:
        return B                                   # single step, block == full dim
    n_steps = max(2, -(-B // max_tile))            # >= 2 steps, tile <= max_tile
    return _rup8(-(-B // n_steps))


# ---------------------------------------------------------------------------
# Wrapper
# ---------------------------------------------------------------------------
def three_layer_mlp_ours(x, params, *, tile_b=None, vmem_limit_bytes=None):
    B, din = x.shape
    E = params["w5a"].shape[0]
    nb = params["w5c"].shape[-1]
    dim_out = params["w3"].shape[-1]

    packed, m = pack_params(params, din, nb, E, dim_out)
    c1p, c2p, c3p, c3 = m["c1p"], m["c2p"], m["c3p"], m["c3"]

    if tile_b is None:
        tile_b = _pick_tile_b(B)
    tile_b = min(tile_b, _rup8(B))                 # never pad past one 8-row tile

    # pad ragged batches up to a multiple of tile_b; pad rows are dropped below
    B_pad = _rup(B, tile_b)
    if B_pad != B:
        x_in = jnp.zeros((B_pad, din), x.dtype).at[:B, :].set(x)
    else:
        x_in = x
    if tile_b != B_pad:
        assert tile_b % 8 == 0, "tile_b must be a multiple of 8 when tiling the batch"
    grid = (B_pad // tile_b,)

    if vmem_limit_bytes is None:
        # double-buffered x/out tiles + double-buffered resident params
        # + h1/h2 intermediates, with 2x headroom; floor 32 MiB (v5e default
        # is only 16 MiB), cap below v7x's 64 MiB physical VMEM.
        est = 4 * (2 * tile_b * 128 + 2 * tile_b * c3p + 2 * int(packed.size)
                   + tile_b * (c1p + c2p))
        vmem_limit_bytes = min(60 * 1024 * 1024, max(32 * 1024 * 1024, 2 * est))

    kernel = _make_kernel(m["din"], c1p, c2p, c3p,
                          m["ow1"], m["ob1"], m["ow2"], m["ob2"],
                          m["ow3"], m["ob3"])

    flops = int(2 * B_pad * (din * c1p + c1p * c2p + c2p * c3p))
    bytes_accessed = int(packed.size) * 4 + int(B_pad * (din + c3p)) * 4

    out = pl.pallas_call(
        kernel,
        out_shape=jax.ShapeDtypeStruct((B_pad, c3p), jnp.float32),
        grid=grid,
        in_specs=[
            pl.BlockSpec((tile_b, din), lambda i: (i, 0)),        # x tiles
            pl.BlockSpec(packed.shape, lambda i: (0, 0)),         # resident params
        ],
        out_specs=pl.BlockSpec((tile_b, c3p), lambda i: (i, 0)),  # lane-dense (128k)
        compiler_params=pltpu.CompilerParams(
            dimension_semantics=("parallel",),
            vmem_limit_bytes=int(vmem_limit_bytes)),
        cost_estimate=pl.CostEstimate(flops=flops, transcendentals=0,
                                      bytes_accessed=bytes_accessed),
    )(x_in, packed)

    out = out[:B, :c3]                                  # drop batch + lane padding
    y_res = out[:, 0:dim_out]
    weight_expert = out[:, dim_out:dim_out + E]
    coeff = out[:, dim_out + E:dim_out + E + E * nb].reshape(B, E, nb)
    return y_res, coeff, weight_expert


# ---------------------------------------------------------------------------
# Init + pure-JAX reference
# ---------------------------------------------------------------------------
def init_params(key, dim_in, num_basis, num_experts, dim_out=NumClass):
    """Deterministic synthetic init (shapes from the module's __init__)."""
    def lin(k, fan_in, fan_out):
        k1, k2 = jax.random.split(k)
        bound = 1.0 / np.sqrt(fan_in)
        w = jax.random.uniform(k1, (fan_in, fan_out), jnp.float32, -bound, bound)
        b = jax.random.uniform(k2, (1, fan_out), jnp.float32, -bound, bound)
        return w, b

    keys = jax.random.split(key, 6 + 3 * num_experts)
    p = {}
    p["w1"], p["b1"] = lin(keys[0], dim_in, 64)
    p["w2"], p["b2"] = lin(keys[1], 64, 32)
    p["w3"], p["b3"] = lin(keys[2], 32, dim_out)
    p["w4a"], p["b4a"] = lin(keys[3], 2, 32)
    p["w4b"], p["b4b"] = lin(keys[4], 32, 16)
    p["w4c"], p["b4c"] = lin(keys[5], 16, num_experts)

    w5a, b5a, w5b, b5b, w5c, b5c = [], [], [], [], [], []
    for i in range(num_experts):
        wa, ba = lin(keys[6 + 3 * i + 0], 2, 32)
        wb, bb = lin(keys[6 + 3 * i + 1], 32, 16)
        wc, bc = lin(keys[6 + 3 * i + 2], 16, num_basis)
        w5a.append(wa); b5a.append(ba)
        w5b.append(wb); b5b.append(bb)
        w5c.append(wc); b5c.append(bc)
    p["w5a"] = jnp.stack(w5a)   # (E, 2, 32)
    p["b5a"] = jnp.stack(b5a)   # (E, 1, 32)
    p["w5b"] = jnp.stack(w5b)   # (E, 32, 16)
    p["b5b"] = jnp.stack(b5b)   # (E, 1, 16)
    p["w5c"] = jnp.stack(w5c)   # (E, 16, num_basis)
    p["b5c"] = jnp.stack(b5c)   # (E, 1, num_basis)
    return p


def reference_forward(x, p):
    """Pure-JAX reference of the PyTorch forward (eval-mode dropout)."""
    relu = lambda v: jnp.maximum(v, 0.0)
    h = relu(x @ p["w1"] + p["b1"])
    h = relu(h @ p["w2"] + p["b2"])
    y_res = h @ p["w3"] + p["b3"]
    g = relu(x @ p["w4a"] + p["b4a"])
    g = relu(g @ p["w4b"] + p["b4b"])
    wexp = g @ p["w4c"] + p["b4c"]
    outs = []
    for i in range(p["w5a"].shape[0]):
        e = relu(x @ p["w5a"][i] + p["b5a"][i])
        e = relu(e @ p["w5b"][i] + p["b5b"][i])
        outs.append(e @ p["w5c"][i] + p["b5c"][i])
    coeff = jnp.stack(outs, axis=1)
    return y_res, coeff, wexp


if __name__ == "__main__":
    dim_in = 2        # fc4 / experts take Linear(2, ...) on x, so dim_in == 2
    num_basis = 8
    num_experts = 4
    batch = 16

    key = jax.random.PRNGKey(0)
    k_x, k_p = jax.random.split(key)
    x = jax.random.normal(k_x, (batch, dim_in), dtype=jnp.float32)
    params = init_params(k_p, dim_in, num_basis, num_experts)

    # tile_b=8 exercises the parallel batch grid (grid=(2,)).
    y_res, coeff, weight_expert = three_layer_mlp_ours(x, params, tile_b=8)
    jax.block_until_ready((y_res, coeff, weight_expert))

    # sanity check against pure-JAX reference
    y_ref, c_ref, w_ref = reference_forward(x, params)
    np.testing.assert_allclose(np.asarray(y_res), np.asarray(y_ref), rtol=1e-5, atol=1e-5)
    np.testing.assert_allclose(np.asarray(coeff), np.asarray(c_ref), rtol=1e-5, atol=1e-5)
    np.testing.assert_allclose(np.asarray(weight_expert), np.asarray(w_ref), rtol=1e-5, atol=1e-5)

    assert y_res.shape == (batch, NumClass)
    assert coeff.shape == (batch, num_experts, num_basis)
    assert weight_expert.shape == (batch, num_experts)

    # ragged-batch path: B=13 is zero-padded to 16 internally, pad rows dropped
    xr = jax.random.normal(jax.random.fold_in(k_x, 1), (13, dim_in), dtype=jnp.float32)
    yr, cr, wr = three_layer_mlp_ours(xr, params, tile_b=8)
    jax.block_until_ready((yr, cr, wr))
    yr_ref, cr_ref, wr_ref = reference_forward(xr, params)
    np.testing.assert_allclose(np.asarray(yr), np.asarray(yr_ref), rtol=1e-5, atol=1e-5)
    np.testing.assert_allclose(np.asarray(cr), np.asarray(cr_ref), rtol=1e-5, atol=1e-5)
    np.testing.assert_allclose(np.asarray(wr), np.asarray(wr_ref), rtol=1e-5, atol=1e-5)

    print("KERNEL_OK")
</pallas_src>

<mosaic_0001>
module attributes {stable_mosaic.version = 11 : i64} {
  func.func @kernel(%arg0: i32, %arg1: memref<8x2xf32, #tpu.memory_space<vmem>>, %arg2: memref<416x256xf32, #tpu.memory_space<vmem>>, %arg3: memref<8x128xf32, #tpu.memory_space<vmem>>) attributes {dimension_semantics = [#tpu.dimension_semantics<parallel>], iteration_bounds = array<i64: 2>, scalar_prefetch = 0 : i64, scratch_operands = 0 : i64, tpu.core_type = #tpu.core_type<tc>, window_params = [{transform_indices = @transform_0, window_bounds = array<i64: 8, 2>}, {pipeline_mode = #tpu.pipeline_mode<synchronous>, transform_indices = @transform_1, window_bounds = array<i64: 416, 256>}, {transform_indices = @transform_2, window_bounds = array<i64: 8, 128>}]} {
    %c0 = arith.constant 0 : index
    %c0_0 = arith.constant 0 : index
    %0 = vector.load %arg1[%c0, %c0_0] : memref<8x2xf32, #tpu.memory_space<vmem>>, vector<8x2xf32>
    %c8 = arith.constant 8 : index
    %c0_1 = arith.constant 0 : index
    %1 = vector.load %arg2[%c8, %c0_1] : memref<416x256xf32, #tpu.memory_space<vmem>>, vector<1x256xf32>
    %2 = vector.extract_strided_slice %0 {offsets = [0, 0], sizes = [8, 1], strides = [1, 1]} : vector<8x2xf32> to vector<8x1xf32>
    %c0_2 = arith.constant 0 : index
    %c0_3 = arith.constant 0 : index
    %3 = vector.load %arg2[%c0_2, %c0_3] : memref<416x256xf32, #tpu.memory_space<vmem>>, vector<1x256xf32>
    %4 = vector.broadcast %2 : vector<8x1xf32> to vector<8x256xf32>
    %5 = vector.broadcast %3 : vector<1x256xf32> to vector<8x256xf32>
    %6 = arith.mulf %4, %5 : vector<8x256xf32>
    %7 = vector.broadcast %1 : vector<1x256xf32> to vector<8x256xf32>
    %8 = arith.addf %7, %6 : vector<8x256xf32>
    %9 = vector.extract_strided_slice %0 {offsets = [0, 1], sizes = [8, 1], strides = [1, 1]} : vector<8x2xf32> to vector<8x1xf32>
    %c1 = arith.constant 1 : index
    %c0_4 = arith.constant 0 : index
    %10 = vector.load %arg2[%c1, %c0_4] : memref<416x256xf32, #tpu.memory_space<vmem>>, vector<1x256xf32>
    %11 = vector.broadcast %9 : vector<8x1xf32> to vector<8x256xf32>
    %12 = vector.broadcast %10 : vector<1x256xf32> to vector<8x256xf32>
    %13 = arith.mulf %11, %12 : vector<8x256xf32>
    %14 = arith.addf %8, %13 : vector<8x256xf32>
    %cst = arith.constant 0.000000e+00 : f32
    %15 = vector.broadcast %cst : f32 to vector<8x256xf32>
    %16 = arith.maximumf %14, %15 : vector<8x256xf32>
    %c16 = arith.constant 16 : index
    %c0_5 = arith.constant 0 : index
    %17 = vector.load %arg2[%c16, %c0_5] : memref<416x256xf32, #tpu.memory_space<vmem>>, vector<256x128xf32>
    %c272 = arith.constant 272 : index
    %c0_6 = arith.constant 0 : index
    %18 = vector.load %arg2[%c272, %c0_6] : memref<416x256xf32, #tpu.memory_space<vmem>>, vector<1x128xf32>
    %cst_7 = arith.constant dense<0.000000e+00> : vector<8x128xf32>
    %19 = tpu.matmul %16, %17, %cst_7 {dimension_numbers = #tpu.dot_dimension_numbers<[1], [0], [0], [1], [0, 0, 1, 1], [], []>} : vector<8x256xf32>, vector<256x128xf32>, vector<8x128xf32> -> vector<8x128xf32>
    %20 = vector.broadcast %18 : vector<1x128xf32> to vector<8x128xf32>
    %21 = arith.addf %19, %20 : vector<8x128xf32>
    %cst_8 = arith.constant 0.000000e+00 : f32
    %22 = vector.broadcast %cst_8 : f32 to vector<8x128xf32>
    %23 = arith.maximumf %21, %22 : vector<8x128xf32>
    %c280 = arith.constant 280 : index
    %c0_9 = arith.constant 0 : index
    %24 = vector.load %arg2[%c280, %c0_9] : memref<416x256xf32, #tpu.memory_space<vmem>>, vector<128x128xf32>
    %c408 = arith.constant 408 : index
    %c0_10 = arith.constant 0 : index
    %25 = vector.load %arg2[%c408, %c0_10] : memref<416x256xf32, #tpu.memory_space<vmem>>, vector<1x128xf32>
    %cst_11 = arith.constant dense<0.000000e+00> : vector<8x128xf32>
    %26 = tpu.matmul %23, %24, %cst_11 {dimension_numbers = #tpu.dot_dimension_numbers<[1], [0], [0], [1], [0, 0, 1, 1], [], []>} : vector<8x128xf32>, vector<128x128xf32>, vector<8x128xf32> -> vector<8x128xf32>
    %27 = vector.broadcast %25 : vector<1x128xf32> to vector<8x128xf32>
    %28 = arith.addf %26, %27 : vector<8x128xf32>
    %c0_12 = arith.constant 0 : index
    %c0_13 = arith.constant 0 : index
    %29 = vector.load %arg3[%c0_12, %c0_13] : memref<8x128xf32, #tpu.memory_space<vmem>>, vector<8x128xf32>
    tpu.vector_store %arg3[%c0_12, %c0_13], %28 {strides = array<i32>} : memref<8x128xf32, #tpu.memory_space<vmem>>, vector<8x128xf32>,
    return
  }
  func.func @transform_0(%arg0: i32) -> (i32, i32) {
    %c0_i32 = arith.constant 0 : i32
    %c0_i32_0 = arith.constant 0 : i32
    return %arg0, %c0_i32 : i32, i32
  }
  func.func @transform_1(%arg0: i32) -> (i32, i32) {
    %c0_i32 = arith.constant 0 : i32
    %c0_i32_0 = arith.constant 0 : i32
    %c0_i32_1 = arith.constant 0 : i32
    return %c0_i32, %c0_i32_0 : i32, i32
  }
  func.func @transform_2(%arg0: i32) -> (i32, i32) {
    %c0_i32 = arith.constant 0 : i32
    %c0_i32_0 = arith.constant 0 : i32
    return %arg0, %c0_i32 : i32, i32
  }
}

</mosaic_0001>

<bundles_post_ra>
// kernel: tpu_custom_call.1
= control target key start
LH: loop header
LB: loop body
LE: loop exit
PB: predicated region body
PF: predicated region fallthrough
CT: control target
= control target key end

     0   :  { %7 = vsyncpa [#allocation3], 0  ;;  %s889_s0 = inlined_call_operand.vmem [shape: f32[16,2], index: 0, kind: input, shape index: {}]   ;;  %s890_s1 = inlined_call_operand.hbm [shape: f32[416,256], index: 1, kind: input, shape index: {}]   ;;  %s891_s2 = inlined_call_operand.hbm [shape: f32[16,128], index: 2, kind: output, shape index: {}]  }
   0x1   :  { %8 = vsyncpa [#allocation4], 0 }
   0x2   :  { %10 = vsyncpa [#allocation4 + $0x1], 0  ;;  %s761_s9 = smov 0   ;;  %s763_s10 = smov 0  }
   0x3   :  { %s765_s11 = smov 0   ;;  %s767_s12 = smov 0  }
   0x4 LB: > { %s782_s13 = sadd.s32 4294967295, %s736_s12   ;;  %s489_s14 = sadd.s32 4294967294, %s736_s12   ;;  %s736_s12 = sphi %s767_s12, %s899_s12   ;;  %s732_s11 = sphi %s765_s11, %s898_s11   ;;  %s728_s10 = sphi %s763_s10, %s897_s10   ;;  %s724_s9 = sphi %s761_s9, %s896_s9  }
   0x5   : > { %s786_s15 = sadd.s32 1, %s736_s12   ;;  %s70_s16 = sadd.s32 1, %s732_s11 }
   0x6   : > { %s67_s17 = ssub.s32 %s736_s12, %s786_s15  ;;  %p80_p0 = scmp.ne.s32.totalorder %s732_s11, %s728_s10 }
   0x7   : > { %p68_p1 = scmp.eq.s32.totalorder %s67_s17, 0  ;;  %p81_p2 = scmp.eq.s32.totalorder %s782_s13, 1 }
   0x8   : > { %p86_p3 = scmp.ne.s32.totalorder %s728_s10, %s724_s9  ;;  %p87_p4 = scmp.eq.s32.totalorder %s489_s14, 1 }
   0x9   : > { %s797_s18 = scalar_select %p68_p1, %s732_s11, %s70_s16  }
   0xa   : > { %p799_p5 = por %p81_p2, %p80_p0  ;;  %p803_p6 = por %p87_p4, %p86_p3 }
   0xb   : > { %p490_p7 = scmp.ge.s32.totalorder %s736_s12, 1  ;;  %p94_p8 = scmp.lt.s32.totalorder %s736_s12, 3 }
   0xc   : > { %s893_s20 = scalar_select %p803_p6, 1, 0 }
   0xd   : > { %p602_p9 = scmp.eq.s32.totalorder %s782_s13, 0  ;;  %p810_p10 = pnand %p490_p7, %p94_p8 }
   0xe   : > { %s738_s22 = smov [#allocation2]  }
   0xf   : > { %s106_s23 = sshll.u32 %s738_s22, 4  ;;  %p594_p11 = pneg %p810_p10  ;;  %s107_s23 = int_to_ptr.vmem [resolvable:$true] %s106_s23 }
  0x10   : > { %s657_s24 = scalar_lea.vmem %s107_s23, 13312  ;;  %p665_p3 = scmp.lt.s32.totalorder %s107_s23, %s107_s23 }
  0x11   : > { %p595_p12 = pnand %p602_p9, %p594_p11  ;;  %p658_p0 = scmp.ne.s32.totalorder %s107_s23, %s657_s24 }
  0x12   : > { %p666_p4 = scmp.lt.s32.totalorder %s657_s24, %s657_s24 }
  0x13   : > { %p648_p13 = pneg %p595_p12 }
  0x14   : > { %p667_p6 = por %p666_p4, %p665_p3 }
  0x15   : > { %p660_p1 = pnand %p658_p0, %p648_p13 }
  0x17   : > { %p661_p2 = pneg %p660_p1 }
  0x19   : > { %p668_p7 = pnand %p667_p6, %p661_p2 }
  0x1b   : > { %671 = shalt.err (!%p668_p7)
}
  0x1c   : > { %s739_s25 = smov 256   ;;  %s740_s26 = smov 16  }
  0x1d   : > { %597 = dma.hbm_to_vmem [thread:$0]  (!%p595_p12), %s890_s1, 13312, %s107_s23, [#allocation3], %s739_s25, %s739_s25, %s740_s26  }
  0x1e   : > { %129 = sbr.rel (%p810_p10) target bundleno = 588 (0x24c), region = 28 }
  0x23   : > { %715 = dma.done.wait (%p602_p9), [#allocation3], 13312  }
  0x24   : > { %717 = vsyncadd (%p602_p9), [#allocation3], 4294953984  ;;  %p150_p8 = scmp.lt.s32.totalorder %s782_s13, 1  ;;  %v741_v0 = vmov 0   ;;  %v243_v2 = vld [vmem:[#allocation2 + $0x210] sm:$0xff]  ;;  %v242_v4 = vld [vmem:[#allocation2 + $0x200] sm:$0xff]  ;;  %v164_v47 = vlaneseq }
  0x25   : > { %644 = vset.pattern.permute.xlu0 %v741_v0  ;;  %v227_v3 = vld [vmem:[#allocation2 + $0x110] sm:$0xff]  ;;  %501 = vmatprep.subr.mxu0 %v243_v2  ;;  %v226_v5 = vld [vmem:[#allocation2 + $0x100] sm:$0xff]  ;;  %v742_v9 = vmov 1   ;;  %v743_v16 = vmov 0.0   ;;  %vm744_vm0 = vmmov 0   ;;  %s147_s6 = sand.u32 1, %s728_s10  }
  0x26   : > { %s151_s29 = scalar_select %p150_p8, %s782_s13, 1  ;;  %502 = vmatpush3.msra.mxu0 %v227_v3  ;;  %v241_v6 = vld [vmem:[#allocation2 + $0x1f0] sm:$0xff]  ;;  %v240_v8 = vld [vmem:[#allocation2 + $0x1e0] sm:$0xff]  ;;  %553 = vmatprep.subr.mxu1 %v743_v16  ;;  %v165_v48 = vshrl.u32 %v164_v47, 7 }
  0x27   : > { %503 = vmatprep.subr.mxu0 %v242_v4  ;;  %v225_v7 = vld [vmem:[#allocation2 + $0xf0] sm:$0xff]  ;;  %v224_v10 = vld [vmem:[#allocation2 + $0xe0] sm:$0xff]  ;;  %585 = vmatprep.mubr.msk.f32.mxu1 %vm744_vm0, %v743_v16  ;;  %s495_s7 = sshll.u32 %s147_s6, 3  ;;  %s498_s8 = sshll.u32 %s782_s13, 7 }
  0x28   : > { %s496_s30 = sshll.u32 %s151_s29, 3  ;;  %504 = vmatpush3.msra.mxu0 %v226_v5  ;;  %v239_v11 = vld [vmem:[#allocation2 + $0x1d0] sm:$0xff]  ;;  %v238_v13 = vld [vmem:[#allocation2 + $0x1c0] sm:$0xff]  ;;  %v166_v49 = vsub.s32 0, %v165_v48  ;;  %v170_v50 = vsub.s32 1, %v165_v48  ;;  %s149_s14 = scalar_lea.vmem [#allocation5], %s495_s7 }
  0x29   : > { %s153_s5 = scalar_lea.vmem %s889_s0, %s496_s30  ;;  %505 = vmatprep.subr.mxu0 %v241_v6  ;;  %v223_v12 = vld [vmem:[#allocation2 + $0xd0] sm:$0xff]  ;;  %v222_v14 = vld [vmem:[#allocation2 + $0xc0] sm:$0xff]  ;;  %s418_s16 = sshll.u32 %s149_s14, 4  ;;  %s419_s16 = int_to_ptr.vmem [resolvable:$true] %s418_s16 }
  0x2a   : > { %v154_v1 = vld [vmem:[%s153_s5] sm:$0xff]  ;;  %506 = vmatpush3.msra.mxu0 %v225_v7  ;;  %v237_v15 = vld [vmem:[#allocation2 + $0x1b0] sm:$0xff]  ;;  %s854_s22 = scalar_lea.hbm %s891_s2, %s498_s8  ;;  %s405_s23 = scalar_lea.sflag [#allocation4], %s147_s6 }
  0x2b   : > { %160 = vperm.xlu0 %644, %v154_v1   ;;  %507 = vmatprep.subr.mxu0 %v240_v8  ;;  %v221_v17 = vld [vmem:[#allocation2 + $0xb0] sm:$0xff]  ;;  %v236_v18 = vld [vmem:[#allocation2 + $0x1a0] sm:$0xff]  ;;  %s672_s24 = scalar_lea.vmem %s419_s16, 128  ;;  %s745_s25 = smov [#allocation5]  }
  0x2c   : > { %508 = vmatpush3.msra.mxu0 %v224_v10  ;;  %v331_v19 = vld [vmem:[#allocation2 + $0x320] sm:$0xff]  ;;  %v330_v20 = vld [vmem:[#allocation2 + $0x310] sm:$0xff]  ;;  %p673_p6 = scmp.ne.s32.totalorder %s419_s16, %s672_s24  ;;  %s676_s13 = sshll.u32 %s745_s25, 4  ;;  %s677_s13 = int_to_ptr.vmem [resolvable:$false] %s676_s13 }
  0x2d   : > { %509 = vmatprep.subr.mxu0 %v239_v11  ;;  %v220_v21 = vld [vmem:[#allocation2 + $0xa0] sm:$0xff]  ;;  %554 = vmatpush3.msra.mxu1 %v331_v19  ;;  %v235_v22 = vld [vmem:[#allocation2 + $0x190] sm:$0xff]  ;;  %s678_s26 = scalar_lea.vmem %s677_s13, 256  ;;  %p679_p11 = scmp.lt.s32.totalorder %s419_s16, %s677_s13 }
  0x2e   : > { %510 = vmatpush3.msra.mxu0 %v223_v12  ;;  %555 = vmatprep.subr.mxu1 %v743_v16  ;;  %v329_v23 = vld [vmem:[#allocation2 + $0x300] sm:$0xff]  ;;  %v219_v24 = vld [vmem:[#allocation2 + $0x90] sm:$0xff]  ;;  %p674_p9 = pnand %p673_p6, %p799_p5  ;;  %p680_p12 = scmp.lt.s32.totalorder %s678_s26, %s672_s24 }
  0x2f   : > { %645 = vset.pattern.permute.xlu0 %v742_v9  ;;  %511 = vmatprep.subr.mxu0 %v238_v13  ;;  %v234_v25 = vld [vmem:[#allocation2 + $0x180] sm:$0xff]  ;;  %v328_v26 = vld [vmem:[#allocation2 + $0x2f0] sm:$0xff] }
  0x30   : > { %192 = vperm.xlu0 %645, %v154_v1   ;;  %512 = vmatpush3.msra.mxu0 %v222_v14  ;;  %v218_v27 = vld [vmem:[#allocation2 + $0x80] sm:$0xff]  ;;  %v233_v28 = vld [vmem:[#allocation2 + $0x170] sm:$0xff]  ;;  %p675_p10 = pneg %p674_p9  ;;  %p681_p13 = por %p680_p12, %p679_p11 }
  0x31   : > { %513 = vmatprep.subr.mxu0 %v237_v15  ;;  %556 = vmatpush3.msra.mxu1 %v330_v20  ;;  %v327_v29 = vld [vmem:[#allocation2 + $0x2e0] sm:$0xff]  ;;  %v217_v30 = vld [vmem:[#allocation2 + $0x70] sm:$0xff] }
  0x32   : > { %514 = vmatpush3.msra.mxu0 %v221_v17  ;;  %557 = vmatprep.subr.mxu1 %v743_v16  ;;  %v232_v31 = vld [vmem:[#allocation2 + $0x160] sm:$0xff]  ;;  %v326_v32 = vld [vmem:[#allocation2 + $0x2d0] sm:$0xff]  ;;  %p682_p0 = pnand %p681_p13, %p675_p10 }
  0x33   : > { %515 = vmatprep.subr.mxu0 %v236_v18  ;;  %558 = vmatpush3.msra.mxu1 %v329_v23  ;;  %v216_v33 = vld [vmem:[#allocation2 + $0x60] sm:$0xff]  ;;  %v231_v34 = vld [vmem:[#allocation2 + $0x150] sm:$0xff] }
  0x34   : > { %516 = vmatpush3.msra.mxu0 %v220_v21  ;;  %559 = vmatprep.subr.mxu1 %v743_v16  ;;  %v325_v35 = vld [vmem:[#allocation2 + $0x2c0] sm:$0xff]  ;;  %v215_v36 = vld [vmem:[#allocation2 + $0x50] sm:$0xff] }
  0x35   : > { %517 = vmatprep.subr.mxu0 %v235_v22  ;;  %560 = vmatpush3.msra.mxu1 %v328_v26  ;;  %v230_v37 = vld [vmem:[#allocation2 + $0x140] sm:$0xff]  ;;  %v324_v38 = vld [vmem:[#allocation2 + $0x2b0] sm:$0xff] }
  0x36   : > { %518 = vmatpush3.msra.mxu0 %v219_v24  ;;  %561 = vmatprep.subr.mxu1 %v743_v16  ;;  %v214_v39 = vld [vmem:[#allocation2 + $0x40] sm:$0xff]  ;;  %v229_v40 = vld [vmem:[#allocation2 + $0x130] sm:$0xff] }
  0x37   : > { %519 = vmatprep.subr.mxu0 %v234_v25  ;;  %562 = vmatpush3.msra.mxu1 %v327_v29  ;;  %v323_v41 = vld [vmem:[#allocation2 + $0x2a0] sm:$0xff]  ;;  %v213_v42 = vld [vmem:[#allocation2 + $0x30] sm:$0xff] }
  0x38   : > { %520 = vmatpush3.msra.mxu0 %v218_v27  ;;  %563 = vmatprep.subr.mxu1 %v743_v16  ;;  %v228_v43 = vld [vmem:[#allocation2 + $0x120] sm:$0xff]  ;;  %v322_v44 = vld [vmem:[#allocation2 + $0x290] sm:$0xff] }
  0x39   : > { %521 = vmatprep.subr.mxu0 %v233_v28  ;;  %564 = vmatpush3.msra.mxu1 %v326_v32  ;;  %v212_v45 = vld [vmem:[#allocation2 + $0x20] sm:$0xff]  ;;  %v156_v52 = vld [vmem:[#allocation2 + $0x10] ss:$8 sm:$0x3] }
  0x3a   : > { %522 = vmatpush3.msra.mxu0 %v217_v30  ;;  %565 = vmatprep.subr.mxu1 %v743_v16  ;;  %v321_v46 = vld [vmem:[#allocation2 + $0x280] sm:$0xff]  ;;  %v180_v57 = vrot.slane %v156_v52, %v166_v49  ;;  %v184_v58 = vrot.slane %v156_v52, %v170_v50  ;;  %v320_v8 = vld [vmem:[#allocation2 + $0x270] sm:$0xff] }
  0x3b   : > { %523 = vmatprep.subr.mxu0 %v232_v31  ;;  %566 = vmatpush3.msra.mxu1 %v325_v35  ;;  %v157_v51 = vld [vmem:[#allocation2] ss:$8 sm:$0x3]  ;;  %v190_v55 = vld [vmem:[#allocation2 + $0x1] ss:$8 sm:$0x3] }
  0x3c   : > { %524 = vmatpush3.msra.mxu0 %v216_v33  ;;  %567 = vmatprep.subr.mxu1 %v743_v16  ;;  %v167_v53 = vrot.slane %v157_v51, %v166_v49  ;;  %v171_v54 = vrot.slane %v157_v51, %v170_v50  ;;  %v199_v61 = vrot.slane %v190_v55, %v166_v49  ;;  %v319_v9 = vld [vmem:[#allocation2 + $0x260] sm:$0xff]  ;;  %v318_v10 = vld [vmem:[#allocation2 + $0x250] sm:$0xff] }
  0x3d   : > { %525 = vmatprep.subr.mxu0 %v231_v34  ;;  %568 = vmatpush3.msra.mxu1 %v324_v38  ;;  %v203_v62 = vrot.slane %v190_v55, %v170_v50  ;;  %v317_v11 = vld [vmem:[#allocation2 + $0x240] sm:$0xff]  ;;  %v316_v12 = vld [vmem:[#allocation2 + $0x230] sm:$0xff] }
  0x3e   : > { %526 = vmatpush3.msra.mxu0 %v215_v36  ;;  %569 = vmatprep.subr.mxu1 %v743_v16  ;;  %v244_v14 = vld [vmem:[#allocation2 + $0x220] ss:$0 sm:$0xff]  ;;  %v332_v20 = vld [vmem:[#allocation2 + $0x330] ss:$0 sm:$0xff] }
  0x3f   : > { %527 = vmatprep.subr.mxu0 %v230_v37  ;;  %570 = vmatpush3.msra.mxu1 %v323_v41 }
  0x40   : > { %528 = vmatpush3.msra.mxu0 %v214_v39  ;;  %571 = vmatprep.subr.mxu1 %v743_v16 }
  0x41   : > { %529 = vmatprep.subr.mxu0 %v229_v40  ;;  %572 = vmatpush3.msra.mxu1 %v322_v44 }
  0x42   : > { %530 = vmatpush3.msra.mxu0 %v213_v42  ;;  %573 = vmatprep.subr.mxu1 %v743_v16 }
  0x43   : > { %531 = vmatprep.subr.mxu0 %v228_v43  ;;  %574 = vmatpush3.msra.mxu1 %v321_v46 }
  0x44   : > { %532 = vmatpush3.msra.mxu0 %v212_v45  ;;  %575 = vmatprep.subr.mxu1 %v743_v16 }
  0x45   : > { %576 = vmatpush3.msra.mxu1 %v320_v8 }
  0x46   : > { %577 = vmatprep.subr.mxu1 %v743_v16 }
  0x47   : > { %578 = vmatpush3.msra.mxu1 %v319_v9 }
  0x48   : > { %579 = vmatprep.subr.mxu1 %v743_v16 }
  0x49   : > { %580 = vmatpush3.msra.mxu1 %v318_v10 }
  0x4a   : > { %581 = vmatprep.subr.mxu1 %v743_v16 }
  0x4b   : > { %582 = vmatpush3.msra.mxu1 %v317_v11 }
  0x4c   : > { %583 = vmatprep.subr.mxu1 %v743_v16 }
  0x4d   : > { %584 = vmatpush3.msra.mxu1 %v316_v12 }
  0xa6   : > { %v161_v56 = vpop.permute.xlu0 %160 }
  0xa7   : > { %v174_v59 = vmul.f32 %v167_v53, %v161_v56  ;;  %v175_v60 = vmul.f32 %v171_v54, %v161_v56 }
  0xa9   : > { %v187_v0 = vadd.f32 %v180_v57, %v174_v59  ;;  %v188_v3 = vadd.f32 %v184_v58, %v175_v60 }
  0xab   : > { %v193_v63 = vpop.permute.xlu0 %192 }
  0xac   : > { %v206_v1 = vmul.f32 %v199_v61, %v193_v63  ;;  %v207_v2 = vmul.f32 %v203_v62, %v193_v63 }
  0xae   : > { %v208_v4 = vadd.f32 %v206_v1, %v187_v0  ;;  %v209_v5 = vadd.f32 %v207_v2, %v188_v3 }
  0xb0   : > { %v210_v6 = vmax.f32 %v208_v4, 0.0  ;;  %v211_v7 = vmax.f32 %v209_v5, 0.0 }
  0xb2   : > { %309 = vmatprep.mubr.f32.mxu0 %v211_v7 }
  0xb3   : > { %310 = vmatmul.mubr.f32.vlgmr.msra.gmra.mxu0 %v210_v6 }
 0x173   : > { %v533_v13 = vpop.f32.mrf.mxu0 }
 0x175   : > { %v534_v15 = vpop.f32.mrf.mxu0 }
 0x176   : > { %v535_v17 = vadd.f32 %v534_v15, %v533_v13 }
 0x178   : > { %v312_v18 = vadd.f32 %v535_v17, %v244_v14 }
 0x17a   : > { %v315_v19 = vmax.f32 %v312_v18, 0.0 }
 0x17c   : > { %586 = vmatmul.mubr.f32.vlgmr.msra.gmra.mxu1 %v315_v19 }
 0x23c   : > { %v399_v21 = vpop.f32.mrf.mxu1 }
 0x23d   : > { %v400_v22 = vadd.f32 %v399_v21, %v332_v20 }
 0x23e   : > { %v587_v16 = vpop.f32.mrf.mxu1 }
 0x23f   : > { %403 = vst [vmem:[%s149_s14] sm:$0xff] %v400_v22 }
 0x240   : > { %685 = shalt.err (!%p682_p0)
}
 0x241   : > { %s686_s27 = scalar_lea.hbm %s854_s22, 128  ;;  %s690_s30 = scalar_lea.hbm %s891_s2, 256 }
 0x242   : > { %p687_p1 = scmp.ne.s32.totalorder %s854_s22, %s686_s27  ;;  %p691_p4 = scmp.lt.s32.totalorder %s854_s22, %s891_s2 }
 0x243   : > { %p692_p7 = scmp.lt.s32.totalorder %s690_s30, %s686_s27 }
 0x244   : > { %p688_p2 = pnand %p687_p1, %p799_p5 }
 0x245   : > { %p693_p8 = por %p692_p7, %p691_p4 }
 0x246   : > { %p689_p3 = pneg %p688_p2 }
 0x248   : > { %p694_p6 = pnand %p693_p8, %p689_p3 }
 0x24a   : > { %697 = shalt.err (!%p694_p6)
}
 0x24b   : > { %592 = dma.vmem_to_hbm [thread:$0]  (%p799_p5), %s419_s16, 128, %s854_s22, %s405_s23  }
 0x24c PF: > { %p604_p9 = scmp.ge.s32.totalorder %s736_s12, 2  ;;  %s430_s5 = sand.u32 1, %s724_s9  }
 0x24d   : > { %p895_p10 = scmp.ne.s32.totalorder %s893_s20, 0  ;;  %s431_s6 = scalar_lea.sflag [#allocation4], %s430_s5 }
 0x24f   : > { %p599_p11 = pnand %p604_p9, %p895_p10 }
 0x251   : > { %p600_p12 = pneg %p599_p11 }
 0x253   : > { %719 = dma.done.wait (%p600_p12), %s431_s6, 128  }
 0x254   : > { %721 = vsyncadd (%p600_p12), %s431_s6, 4294967168  ;;  %p13_p13 = scmp.ge.s32.totalorder %s786_s15, 4   ;;  %s896_s9 = smov %s728_s10 }
 0x255   : > { %s897_s10 = smov %s732_s11  ;;  %s898_s11 = smov %s797_s18 }
 0x256   : > { %s899_s12 = smov %s786_s15  ;;  %15 = sbr.rel (!%p13_p13) target bundleno = 4 (0x4), region = 70 }
 0x25b   :  { %436 = vsyncpa [#allocation3], 1 }
 0x25c   :  { %438 = vsyncpa [#allocation3 + $0x1], 1 }
 0x25d   :  { %439 = vsyncpa [#allocation4], 1 }
 0x25e   :  { %441 = vsyncpa [#allocation4 + $0x1], 1 }

</bundles_post_ra>
